<compile_context>
chip_gen: v7x
topology: tpu7x:2x2x1
jax: 0.10.0
libtpu: 0.0.40
codegen_flags: <defaults>
</compile_context>

<pallas_src>
import functools

import jax
import jax.numpy as jnp
from jax.experimental import pallas as pl
from jax.experimental.pallas import tpu as pltpu

LOG_STD_MIN = -5.0
LOG_STD_MAX = 2.0
IN_PAD = 32            # padded feature dim (original input_dim = 31)


def _round_up(x, m):
    return ((x + m - 1) // m) * m


def _actor_kernel(x_ref,
                  w1_ref, b1_ref,
                  w2_ref, b2_ref,
                  wh_ref, bh_ref,
                  out_ref,
                  *, max_u, output_dim):
    x = x_ref[...]                                   # bf16, (TB, IN_PAD)

    # fc1 + relu (bf16 operands, f32 accumulate; elementwise stays f32)
    h = jnp.dot(x, w1_ref[...], preferred_element_type=jnp.float32) + b1_ref[...]
    h = jnp.maximum(h, 0.0)

    # fc2 + relu
    h = jnp.dot(h.astype(jnp.bfloat16), w2_ref[...],
                preferred_element_type=jnp.float32) + b2_ref[...]
    h = jnp.maximum(h, 0.0)

    # fused fc3+heads: fc3 was folded into (hidden, 2*output_dim) weights at
    # parameter-construction time; shared tanh, lane-index select applies
    # `* max_u` (mu half) vs. the log_std rescale (log_std half).
    t = jnp.dot(h.astype(jnp.bfloat16), wh_ref[...],
                preferred_element_type=jnp.float32) + bh_ref[...]
    t = jnp.tanh(t)

    lane = jax.lax.broadcasted_iota(jnp.int32, t.shape, dimension=1)
    mu_half = t * max_u
    ls_half = LOG_STD_MIN + 0.5 * (LOG_STD_MAX - LOG_STD_MIN) * (t + 1.0)
    out_ref[...] = jnp.where(lane < output_dim, mu_half, ls_half).astype(out_ref.dtype)


def skill_conditioned_actor(x, params, *, max_u=1.0, batch_tile=512):
    """x: (B, input_dim) f32. Returns (mu, log_std), each (B, output_dim) f32."""
    B, in_dim = x.shape
    in_pad = params["w1"].shape[0]
    output_dim = params["bh"].shape[1] // 2

    # zero-pad features to the (small) padded dim and cast to bf16
    if in_dim < in_pad:
        x = jnp.pad(x, ((0, 0), (0, in_pad - in_dim)))
    x = x.astype(jnp.bfloat16)

    weight_args = (params["w1"], params["b1"],
                   params["w2"], params["b2"],
                   params["wh"], params["bh"])
    kernel = functools.partial(_actor_kernel,
                               max_u=float(max_u), output_dim=output_dim)

    if B <= batch_tile:
        # Small-batch / latency path: one grid-less invocation, everything in VMEM.
        vmem = pl.BlockSpec(memory_space=pltpu.MemorySpace.VMEM)
        fused = pl.pallas_call(
            kernel,
            out_shape=jax.ShapeDtypeStruct((B, 2 * output_dim), jnp.float32),
            in_specs=[vmem] * (1 + len(weight_args)),
            out_specs=vmem,
        )(x, *weight_args)
    else:
        # Large-batch path: grid over batch, weights VMEM-resident across steps
        # (constant index_map -> copied once), batch axis "parallel" so v7x
        # megacore splits it across TensorCores.
        align = 256 if batch_tile % 256 == 0 else 128
        tile = min(batch_tile, _round_up(pl.cdiv(B, 2), align))  # keep >= 2 steps
        tile = max(128, _round_up(tile, 128))                    # layout minimum
        n_tiles = pl.cdiv(B, tile)
        Bp = n_tiles * tile
        if Bp != B:
            x = jnp.pad(x, ((0, Bp - B), (0, 0)))

        def resident(arr):
            # Constant block index => the pipeline skips re-DMA after step 0;
            # the weights stay VMEM-resident for the whole grid.
            return pl.BlockSpec(arr.shape, lambda i: (0, 0))

        fused = pl.pallas_call(
            kernel,
            out_shape=jax.ShapeDtypeStruct((Bp, 2 * output_dim), jnp.float32),
            grid_spec=pltpu.PrefetchScalarGridSpec(
                num_scalar_prefetch=0,
                grid=(n_tiles,),
                in_specs=[pl.BlockSpec((tile, in_pad), lambda i: (i, 0))]
                         + [resident(a) for a in weight_args],
                out_specs=pl.BlockSpec((tile, 2 * output_dim),
                                       lambda i: (i, 0)),
            ),
            compiler_params=pltpu.CompilerParams(
                dimension_semantics=("parallel",)),
        )(x, *weight_args)
        fused = fused[:B]

    mu = fused[:, :output_dim]
    log_std = fused[:, output_dim:]
    return mu, log_std


def make_params(key, input_dim=31, hidden=256, output_dim=4, in_pad=IN_PAD):
    """Synthetic nn.Linear-style params.

    Returns (kernel_params, raw_f32_params):
      kernel_params: bf16 weights as (in, out); w1 rows beyond input_dim are
        zero; fc3 is folded into the concatenated mu/log_std head.
      raw_f32_params: the unfolded f32 parameters (original module layout) for
        the loose semantics check.
    """
    ks = jax.random.split(key, 10)

    def lin(kw, kb, fan_in, fan_out):
        bound = 1.0 / jnp.sqrt(jnp.float32(fan_in))
        w = jax.random.uniform(kw, (fan_in, fan_out), jnp.float32, -bound, bound)
        b = jax.random.uniform(kb, (1, fan_out), jnp.float32, -bound, bound)
        return w, b

    w1, b1 = lin(ks[0], ks[1], input_dim, hidden)
    w2, b2 = lin(ks[2], ks[3], hidden, hidden)
    w3, b3 = lin(ks[4], ks[5], hidden, hidden)
    wmu, bmu = lin(ks[6], ks[7], hidden, output_dim)
    wls, bls = lin(ks[8], ks[9], hidden, output_dim)

    raw = dict(w1=w1, b1=b1, w2=w2, b2=b2, w3=w3, b3=b3,
               wmu=wmu, bmu=bmu, wls=wls, bls=bls)

    # fc3 folded into the fused (mu|log_std) head, computed in full f32.
    hi = jax.lax.Precision.HIGHEST
    wh_full = jnp.concatenate([wmu, wls], axis=1)                 # (hidden, 2*out)
    bh_full = jnp.concatenate([bmu, bls], axis=1)                 # (1, 2*out)
    w3h = jnp.dot(w3, wh_full, precision=hi)                      # (hidden, 2*out)
    b3h = jnp.dot(b3, wh_full, precision=hi) + bh_full            # (1, 2*out)

    w1p = jnp.pad(w1, ((0, in_pad - input_dim), (0, 0)))          # zero-padded rows

    bf16 = jnp.bfloat16
    kernel_params = dict(w1=w1p.astype(bf16), b1=b1,
                         w2=w2.astype(bf16), b2=b2,
                         wh=w3h.astype(bf16), bh=b3h)
    return kernel_params, raw


def reference_forward(x, p, max_u=1.0):
    """Plain-JAX reference with the same folded / bf16-operand / f32-acc numerics."""
    in_pad = p["w1"].shape[0]
    out = p["bh"].shape[1] // 2
    xb = jnp.pad(x, ((0, 0), (0, in_pad - x.shape[1]))).astype(jnp.bfloat16)
    h = jnp.maximum(jnp.dot(xb, p["w1"], preferred_element_type=jnp.float32) + p["b1"], 0.0)
    h = jnp.maximum(jnp.dot(h.astype(jnp.bfloat16), p["w2"],
                            preferred_element_type=jnp.float32) + p["b2"], 0.0)
    t = jnp.tanh(jnp.dot(h.astype(jnp.bfloat16), p["wh"],
                         preferred_element_type=jnp.float32) + p["bh"])
    mu = t[:, :out] * max_u
    ls = LOG_STD_MIN + 0.5 * (LOG_STD_MAX - LOG_STD_MIN) * (t[:, out:] + 1.0)
    return mu, ls


def reference_forward_f32(x, p, max_u=1.0):
    """Original (unfolded) module math in f32: loose semantics check only."""
    h = jnp.maximum(x @ p["w1"] + p["b1"], 0.0)
    h = jnp.maximum(h @ p["w2"] + p["b2"], 0.0)
    h = h @ p["w3"] + p["b3"]
    mu = jnp.tanh(h @ p["wmu"] + p["bmu"]) * max_u
    ls = jnp.tanh(h @ p["wls"] + p["bls"])
    ls = LOG_STD_MIN + 0.5 * (LOG_STD_MAX - LOG_STD_MIN) * (ls + 1.0)
    return mu, ls


if __name__ == "__main__":
    key = jax.random.PRNGKey(0)
    k_x1, k_x2, k_x3, k_p = jax.random.split(key, 4)

    INPUT_DIM, HIDDEN, OUTPUT_DIM = 31, 256, 4
    MAX_U = 1.0
    params, raw_params = make_params(k_p, INPUT_DIM, HIDDEN, OUTPUT_DIM)

    # 1) Small-batch (grid-less, latency) path.
    x_small = jax.random.normal(k_x1, (8, INPUT_DIM), jnp.float32)
    mu_s, ls_s = skill_conditioned_actor(x_small, params, max_u=MAX_U)
    jax.block_until_ready((mu_s, ls_s))
    mu_r, ls_r = reference_forward(x_small, params, MAX_U)
    assert jnp.allclose(mu_s, mu_r, atol=2e-3, rtol=2e-3)
    assert jnp.allclose(ls_s, ls_r, atol=2e-3, rtol=2e-3)

    # 2) Large-batch gridded path, default tile (>= 2 grid steps), B not a
    #    tile multiple to exercise padding + trim.
    x_large = jax.random.normal(k_x2, (777, INPUT_DIM), jnp.float32)
    mu_l, ls_l = skill_conditioned_actor(x_large, params, max_u=MAX_U)
    jax.block_until_ready((mu_l, ls_l))
    mu_r2, ls_r2 = reference_forward(x_large, params, MAX_U)
    assert jnp.allclose(mu_l, mu_r2, atol=2e-3, rtol=2e-3)
    assert jnp.allclose(ls_l, ls_r2, atol=2e-3, rtol=2e-3)

    # 3) Gridded path with an explicitly small (sweepable) tile.
    x_mid = jax.random.normal(k_x3, (200, INPUT_DIM), jnp.float32)
    mu_m, ls_m = skill_conditioned_actor(x_mid, params, max_u=MAX_U, batch_tile=128)
    jax.block_until_ready((mu_m, ls_m))
    mu_r3, ls_r3 = reference_forward(x_mid, params, MAX_U)
    assert jnp.allclose(mu_m, mu_r3, atol=2e-3, rtol=2e-3)
    assert jnp.allclose(ls_m, ls_r3, atol=2e-3, rtol=2e-3)

    # 4) Loose semantics check vs. the original (unfolded) f32 module math
    #    (differences come only from bf16 weight rounding + the f32 fc3 fold).
    mu_f, ls_f = reference_forward_f32(x_small, raw_params, MAX_U)
    assert jnp.max(jnp.abs(mu_s - mu_f)) < 0.1
    assert jnp.max(jnp.abs(ls_s - ls_f)) < 0.1

    print("KERNEL_OK")
</pallas_src>

<mosaic_0001>
module attributes {stable_mosaic.version = 11 : i64} {
  func.func @_actor_kernel(%arg0: memref<8x32xbf16, #tpu.memory_space<vmem>>, %arg1: memref<32x256xbf16, #tpu.memory_space<vmem>>, %arg2: memref<1x256xf32, #tpu.memory_space<vmem>>, %arg3: memref<256x256xbf16, #tpu.memory_space<vmem>>, %arg4: memref<1x256xf32, #tpu.memory_space<vmem>>, %arg5: memref<256x8xbf16, #tpu.memory_space<vmem>>, %arg6: memref<1x8xf32, #tpu.memory_space<vmem>>, %arg7: memref<8x8xf32, #tpu.memory_space<vmem>>) attributes {dimension_semantics = [], scalar_prefetch = 0 : i64, scratch_operands = 0 : i64, tpu.core_type = #tpu.core_type<tc>} {
    %c0 = arith.constant 0 : index
    %c0_0 = arith.constant 0 : index
    %0 = vector.load %arg0[%c0, %c0_0] : memref<8x32xbf16, #tpu.memory_space<vmem>>, vector<8x32xbf16>
    %c0_1 = arith.constant 0 : index
    %c0_2 = arith.constant 0 : index
    %1 = vector.load %arg1[%c0_1, %c0_2] : memref<32x256xbf16, #tpu.memory_space<vmem>>, vector<32x256xbf16>
    %cst = arith.constant dense<0.000000e+00> : vector<8x256xf32>
    %2 = tpu.matmul %0, %1, %cst {dimension_numbers = #tpu.dot_dimension_numbers<[1], [0], [0], [1], [0, 0, 1, 1], [], []>} : vector<8x32xbf16>, vector<32x256xbf16>, vector<8x256xf32> -> vector<8x256xf32>
    %c0_3 = arith.constant 0 : index
    %c0_4 = arith.constant 0 : index
    %3 = vector.load %arg2[%c0_3, %c0_4] : memref<1x256xf32, #tpu.memory_space<vmem>>, vector<1x256xf32>
    %4 = vector.broadcast %3 : vector<1x256xf32> to vector<8x256xf32>
    %5 = arith.addf %2, %4 : vector<8x256xf32>
    %cst_5 = arith.constant 0.000000e+00 : f32
    %6 = vector.broadcast %cst_5 : f32 to vector<8x256xf32>
    %7 = arith.maximumf %5, %6 : vector<8x256xf32>
    %8 = arith.truncf %7 : vector<8x256xf32> to vector<8x256xbf16>
    %c0_6 = arith.constant 0 : index
    %c0_7 = arith.constant 0 : index
    %9 = vector.load %arg3[%c0_6, %c0_7] : memref<256x256xbf16, #tpu.memory_space<vmem>>, vector<256x256xbf16>
    %cst_8 = arith.constant dense<0.000000e+00> : vector<8x256xf32>
    %10 = tpu.matmul %8, %9, %cst_8 {dimension_numbers = #tpu.dot_dimension_numbers<[1], [0], [0], [1], [0, 0, 1, 1], [], []>} : vector<8x256xbf16>, vector<256x256xbf16>, vector<8x256xf32> -> vector<8x256xf32>
    %c0_9 = arith.constant 0 : index
    %c0_10 = arith.constant 0 : index
    %11 = vector.load %arg4[%c0_9, %c0_10] : memref<1x256xf32, #tpu.memory_space<vmem>>, vector<1x256xf32>
    %12 = vector.broadcast %11 : vector<1x256xf32> to vector<8x256xf32>
    %13 = arith.addf %10, %12 : vector<8x256xf32>
    %cst_11 = arith.constant 0.000000e+00 : f32
    %14 = vector.broadcast %cst_11 : f32 to vector<8x256xf32>
    %15 = arith.maximumf %13, %14 : vector<8x256xf32>
    %16 = arith.truncf %15 : vector<8x256xf32> to vector<8x256xbf16>
    %c0_12 = arith.constant 0 : index
    %c0_13 = arith.constant 0 : index
    %17 = vector.load %arg5[%c0_12, %c0_13] : memref<256x8xbf16, #tpu.memory_space<vmem>>, vector<256x8xbf16>
    %cst_14 = arith.constant dense<0.000000e+00> : vector<8x8xf32>
    %18 = tpu.matmul %16, %17, %cst_14 {dimension_numbers = #tpu.dot_dimension_numbers<[1], [0], [0], [1], [0, 0, 1, 1], [], []>} : vector<8x256xbf16>, vector<256x8xbf16>, vector<8x8xf32> -> vector<8x8xf32>
    %c0_15 = arith.constant 0 : index
    %c0_16 = arith.constant 0 : index
    %19 = vector.load %arg6[%c0_15, %c0_16] : memref<1x8xf32, #tpu.memory_space<vmem>>, vector<1x8xf32>
    %20 = vector.broadcast %19 : vector<1x8xf32> to vector<8x8xf32>
    %21 = arith.addf %18, %20 : vector<8x8xf32>
    %22 = math.tanh %21 : vector<8x8xf32>
    %23 = tpu.iota {dimensions = array<i32: 1>} : vector<8x8xi32>
    %cst_17 = arith.constant 1.000000e+00 : f32
    %24 = vector.broadcast %cst_17 : f32 to vector<8x8xf32>
    %25 = arith.mulf %22, %24 : vector<8x8xf32>
    %cst_18 = arith.constant 1.000000e+00 : f32
    %26 = vector.broadcast %cst_18 : f32 to vector<8x8xf32>
    %27 = arith.addf %22, %26 : vector<8x8xf32>
    %cst_19 = arith.constant 3.500000e+00 : f32
    %28 = vector.broadcast %cst_19 : f32 to vector<8x8xf32>
    %29 = arith.mulf %28, %27 : vector<8x8xf32>
    %cst_20 = arith.constant -5.000000e+00 : f32
    %30 = vector.broadcast %cst_20 : f32 to vector<8x8xf32>
    %31 = arith.addf %30, %29 : vector<8x8xf32>
    %c4_i32 = arith.constant 4 : i32
    %32 = vector.broadcast %c4_i32 : i32 to vector<8x8xi32>
    %33 = arith.cmpi slt, %23, %32 : vector<8x8xi32>
    %34 = arith.select %33, %25, %31 : vector<8x8xi1>, vector<8x8xf32>
    %c0_21 = arith.constant 0 : index
    %c0_22 = arith.constant 0 : index
    %35 = vector.load %arg7[%c0_21, %c0_22] : memref<8x8xf32, #tpu.memory_space<vmem>>, vector<8x8xf32>
    tpu.vector_store %arg7[%c0_21, %c0_22], %34 {strides = array<i32>} : memref<8x8xf32, #tpu.memory_space<vmem>>, vector<8x8xf32>,
    return
  }
}

</mosaic_0001>

<bundles_post_ra>
// kernel: tpu_custom_call.1
= control target key start
LH: loop header
LB: loop body
LE: loop exit
PB: predicated region body
PF: predicated region fallthrough
CT: control target
= control target key end

     0   :  { %12 = vsyncpa [#allocation3], 0  ;;  %s919_s0 = inlined_call_operand.vmem [shape: bf16[8,32], index: 0, kind: input, shape index: {}]   ;;  %s920_s1 = inlined_call_operand.vmem [shape: bf16[32,256], index: 1, kind: input, shape index: {}]   ;;  %s921_s2 = inlined_call_operand.vmem [shape: f32[1,256], index: 2, kind: input, shape index: {}]   ;;  %s922_s3 = inlined_call_operand.hbm [shape: bf16[256,256], index: 3, kind: input, shape index: {}]   ;;  %s923_s4 = inlined_call_operand.vmem [shape: f32[1,256], index: 4, kind: input, shape index: {}]   ;;  %s924_s5 = inlined_call_operand.vmem [shape: bf16[256,8], index: 5, kind: input, shape index: {}]   ;;  %s925_s6 = inlined_call_operand.vmem [shape: f32[1,8], index: 6, kind: input, shape index: {}]   ;;  %s926_s7 = inlined_call_operand.hbm [shape: f32[8,8], index: 7, kind: output, shape index: {}]  }
   0x1   :  { %13 = vsyncpa [#allocation4], 0  ;;  %s778_s24 = smov [#allocation2]   ;;  %s730_s28 = scalar_lea.hbm %s922_s3, 4096 }
   0x2   :  { %s25_s25 = sshll.u32 %s778_s24, 4  ;;  %p731_p0 = scmp.ne.s32.totalorder %s922_s3, %s730_s28  ;;  %s26_s25 = int_to_ptr.vmem [resolvable:$true] %s25_s25 }
   0x3   :  { %p734_p1 = scmp.lt.u32.totalorder %s730_s28, %s922_s3 }
   0x5   :  { %p736_p2 = pnand %p734_p1, %p731_p0 }
   0x7   :  { %739 = shalt.err (!%p736_p2)
}
   0x8   :  { %s740_s10 = scalar_lea.vmem %s26_s25, 4096  ;;  %p745_p4 = scmp.lt.s32.totalorder %s26_s25, %s26_s25 }
   0x9   :  { %p741_p3 = scmp.ne.s32.totalorder %s26_s25, %s740_s10  ;;  %p746_p5 = scmp.lt.s32.totalorder %s740_s10, %s740_s10 }
   0xb   :  { %p747_p6 = por %p746_p5, %p745_p4 }
   0xd   :  { %p748_p7 = pnand %p747_p6, %p741_p3 }
   0xf   :  { %751 = shalt.err (!%p748_p7)
}
  0x10   :  { %s779_s11 = smov 128   ;;  %s780_s12 = smov 8  }
  0x11   :  { %31 = dma.hbm_to_vmem [thread:$0]  %s922_s3, 4096, %s26_s25, [#allocation3], %s779_s11, %s779_s11, %s780_s12  }
  0x12   :  { %774 = dma.done.wait [#allocation3], 4096  }
  0x13   :  { %775 = vsyncadd [#allocation3], 4294963200  ;;  %v781_v0 = vmov 0   ;;  %v658_v1 = vld [vmem:[%s920_s1 + $0x4] ss:$8 sps:$4 sm:$0xff]   ;;  %vm79_vm0 = vcmask 261120   ;;  %v49_v50 = vlaneseq }
  0x14   :  { %115 = vmatprep.mubr.bf16.mxu0 %v781_v0  ;;  %v660_v2 = vld [vmem:[%s920_s1] ss:$8 sps:$4 sm:$0xff]   ;;  %83 = vmatprep.subr.bf16.mxu0 %v658_v1  ;;  %v661_v3 = vld [vmem:[%s920_s1 + $0x14] ss:$8 sps:$4 sm:$0xff]   ;;  %v663_v4 = vld [vmem:[%s920_s1 + $0x10] ss:$8 sps:$4 sm:$0xff]  }
  0x15   :  { %84 = vmatpush1.bf16.msra.mxu0 %v660_v2  ;;  %v664_v5 = vld [vmem:[#allocation2 + $0x4] ss:$8 sps:$4 sm:$0xff]   ;;  %v666_v6 = vld [vmem:[#allocation2] ss:$8 sps:$4 sm:$0xff]   ;;  %v667_v7 = vld [vmem:[#allocation2 + $0x14] ss:$8 sps:$4 sm:$0xff]  }
  0x16   :  { %85 = vmatprep.subr.bf16.mxu0 %v661_v3  ;;  %332 = vmatprep.subr.bf16.mxu1 %v664_v5  ;;  %v42_v8 = vld [vmem:[%s919_s0] sm:$0xf]  ;;  %v669_v9 = vld [vmem:[#allocation2 + $0x10] ss:$8 sps:$4 sm:$0xff]   ;;  %v670_v10 = vld [vmem:[#allocation2 + $0x24] ss:$8 sps:$4 sm:$0xff]  }
  0x17   :  { %333 = vmatpush1.bf16.msra.mxu1 %v666_v6  ;;  %v672_v11 = vld [vmem:[#allocation2 + $0x20] ss:$8 sps:$4 sm:$0xff]   ;;  %v673_v12 = vld [vmem:[#allocation2 + $0x34] ss:$8 sps:$4 sm:$0xff]   ;;  %v675_v13 = vld [vmem:[#allocation2 + $0x30] ss:$8 sps:$4 sm:$0xff]  }
  0x18   :  { %334 = vmatprep.subr.bf16.mxu1 %v667_v7  ;;  %v676_v14 = vld [vmem:[#allocation2 + $0x44] ss:$8 sps:$4 sm:$0xff]   ;;  %v678_v15 = vld [vmem:[#allocation2 + $0x40] ss:$8 sps:$4 sm:$0xff]   ;;  %v679_v16 = vld [vmem:[#allocation2 + $0x54] ss:$8 sps:$4 sm:$0xff]  }
  0x19   :  { %86 = vmatpush1.bf16.msra.mxu0 %v663_v4  ;;  %v681_v17 = vld [vmem:[#allocation2 + $0x50] ss:$8 sps:$4 sm:$0xff]   ;;  %v682_v18 = vld [vmem:[#allocation2 + $0x64] ss:$8 sps:$4 sm:$0xff]   ;;  %v684_v19 = vld [vmem:[#allocation2 + $0x60] ss:$8 sps:$4 sm:$0xff]  }
  0x1a   :  { %v685_v20 = vld [vmem:[#allocation2 + $0x74] ss:$8 sps:$4 sm:$0xff]   ;;  %v687_v21 = vld [vmem:[#allocation2 + $0x70] ss:$8 sps:$4 sm:$0xff]   ;;  %v688_v22 = vld [vmem:[#allocation2 + $0x84] ss:$8 sps:$4 sm:$0xff]  }
  0x1b   :  { %335 = vmatpush1.bf16.msra.mxu1 %v669_v9  ;;  %v690_v23 = vld [vmem:[#allocation2 + $0x80] ss:$8 sps:$4 sm:$0xff]   ;;  %v691_v24 = vld [vmem:[#allocation2 + $0x94] ss:$8 sps:$4 sm:$0xff]   ;;  %v693_v25 = vld [vmem:[#allocation2 + $0x90] ss:$8 sps:$4 sm:$0xff]  }
  0x1c   :  { %581 = vmatmul.mubr.msk.bf16.vlgmr.msra.gmra.mrb[0].mxu0 %vm79_vm0, %v42_v8  ;;  %336 = vmatprep.subr.bf16.mxu1 %v670_v10  ;;  %v694_v26 = vld [vmem:[#allocation2 + $0xa4] ss:$8 sps:$4 sm:$0xff]   ;;  %v696_v27 = vld [vmem:[#allocation2 + $0xa0] ss:$8 sps:$4 sm:$0xff]   ;;  %v697_v28 = vld [vmem:[#allocation2 + $0xb4] ss:$8 sps:$4 sm:$0xff]  }
  0x1d   :  { %v699_v29 = vld [vmem:[#allocation2 + $0xb0] ss:$8 sps:$4 sm:$0xff]   ;;  %v700_v30 = vld [vmem:[#allocation2 + $0xc4] ss:$8 sps:$4 sm:$0xff]   ;;  %v702_v31 = vld [vmem:[#allocation2 + $0xc0] ss:$8 sps:$4 sm:$0xff]  }
  0x1e   :  { %v703_v32 = vld [vmem:[#allocation2 + $0xd4] ss:$8 sps:$4 sm:$0xff]   ;;  %v705_v33 = vld [vmem:[#allocation2 + $0xd0] ss:$8 sps:$4 sm:$0xff]   ;;  %v706_v34 = vld [vmem:[#allocation2 + $0xe4] ss:$8 sps:$4 sm:$0xff]  }
  0x1f   :  { %337 = vmatpush1.bf16.msra.mxu1 %v672_v11  ;;  %v708_v35 = vld [vmem:[#allocation2 + $0xe0] ss:$8 sps:$4 sm:$0xff]   ;;  %v709_v36 = vld [vmem:[#allocation2 + $0xf4] ss:$8 sps:$4 sm:$0xff]   ;;  %v711_v37 = vld [vmem:[#allocation2 + $0xf0] ss:$8 sps:$4 sm:$0xff]  }
  0x20   :  { %338 = vmatprep.subr.bf16.mxu1 %v673_v12  ;;  %v712_v38 = vld [vmem:[%s924_s5 + $0x40] sm:$0xff]   ;;  %v714_v40 = vld [vmem:[%s924_s5 + $0x48] sm:$0xff]   ;;  %v716_v42 = vld [vmem:[%s924_s5 + $0x50] sm:$0xff]   ;;  %v50_v51 = vshrl.u32 %v49_v50, 7  ;;  %vm560_vm2 = vcmask 64512  }
  0x21   :  { %v713_v39 = vld [vmem:[%s924_s5] sm:$0xff]   ;;  %631 = vmatprep.subr.bf16.mxu0 %v712_v38  ;;  %v715_v41 = vld [vmem:[%s924_s5 + $0x8] sm:$0xff]   ;;  %v717_v43 = vld [vmem:[%s924_s5 + $0x10] sm:$0xff]  }
  0x22   :  { %632 = vmatpush3.bf16.msra.mxu0 %v713_v39  ;;  %v718_v44 = vld [vmem:[%s924_s5 + $0x58] sm:$0xff]   ;;  %v720_v46 = vld [vmem:[%s924_s5 + $0x60] sm:$0xff]   ;;  %v722_v48 = vld [vmem:[%s924_s5 + $0x68] sm:$0xff]   ;;  %v51_v52 = vsub.s32 0, %v50_v51  ;;  %v55_v54 = vsub.s32 1, %v50_v51 }
  0x23   :  { %339 = vmatpush1.bf16.msra.mxu1 %v675_v13  ;;  %633 = vmatprep.subr.bf16.mxu0 %v714_v40  ;;  %v719_v45 = vld [vmem:[%s924_s5 + $0x18] sm:$0xff]   ;;  %v721_v47 = vld [vmem:[%s924_s5 + $0x20] sm:$0xff]   ;;  %v723_v49 = vld [vmem:[%s924_s5 + $0x28] sm:$0xff]  }
  0x24   :  { %340 = vmatprep.subr.bf16.mxu1 %v676_v14  ;;  %v47_v53 = vld [vmem:[%s921_s2] sm:$0x3]  ;;  %v724_v3 = vld [vmem:[%s924_s5 + $0x70] sm:$0xff]   ;;  %v726_v5 = vld [vmem:[%s924_s5 + $0x78] sm:$0xff]  }
  0x25   :  { %v52_v55 = vrot.slane %v47_v53, %v51_v52  ;;  %v56_v56 = vrot.slane %v47_v53, %v55_v54  ;;  %v725_v4 = vld [vmem:[%s924_s5 + $0x30] sm:$0xff]   ;;  %v727_v6 = vld [vmem:[%s924_s5 + $0x38] sm:$0xff]   ;;  %v160_v7 = vld [vmem:[%s923_s4] sm:$0x3]  ;;  %s782_s4 = smov [#allocation5]  }
  0x26   :  { %634 = vmatpush3.bf16.msra.mxu0 %v715_v41  ;;  %v165_v8 = vrot.slane %v160_v7, %v51_v52  ;;  %v169_v9 = vrot.slane %v160_v7, %v55_v54  ;;  %s568_s9 = sshll.u32 %s782_s4, 4  ;;  %s569_s9 = int_to_ptr.vmem [resolvable:$true] %s568_s9 }
  0x27   :  { %341 = vmatpush1.bf16.msra.mxu1 %v678_v15  ;;  %635 = vmatprep.subr.bf16.mxu0 %v716_v42  ;;  %s752_s10 = scalar_lea.vmem %s569_s9, 128  ;;  %p757_p9 = scmp.lt.s32.totalorder %s569_s9, %s569_s9 }
  0x28   :  { %342 = vmatprep.subr.bf16.mxu1 %v679_v16  ;;  %p753_p8 = scmp.ne.s32.totalorder %s569_s9, %s752_s10  ;;  %p758_p10 = scmp.lt.s32.totalorder %s752_s10, %s752_s10 }
  0x2a   :  { %636 = vmatpush3.bf16.msra.mxu0 %v717_v43  ;;  %p759_p11 = por %p758_p10, %p757_p9 }
  0x2b   :  { %343 = vmatpush1.bf16.msra.mxu1 %v681_v17  ;;  %637 = vmatprep.subr.bf16.mxu0 %v718_v44 }
  0x2c   :  { %344 = vmatprep.subr.bf16.mxu1 %v682_v18  ;;  %p760_p12 = pnand %p759_p11, %p753_p8 }
  0x2e   :  { %638 = vmatpush3.bf16.msra.mxu0 %v719_v45 }
  0x2f   :  { %345 = vmatpush1.bf16.msra.mxu1 %v684_v19  ;;  %639 = vmatprep.subr.bf16.mxu0 %v720_v46 }
  0x30   :  { %346 = vmatprep.subr.bf16.mxu1 %v685_v20 }
  0x32   :  { %640 = vmatpush3.bf16.msra.mxu0 %v721_v47 }
  0x33   :  { %347 = vmatpush1.bf16.msra.mxu1 %v687_v21  ;;  %641 = vmatprep.subr.bf16.mxu0 %v722_v48  ;;  %v614_v21 = vld [vmem:[%s925_s6] ss:$0 sm:$0xff] }
  0x34   :  { %348 = vmatprep.subr.bf16.mxu1 %v688_v22 }
  0x36   :  { %642 = vmatpush3.bf16.msra.mxu0 %v723_v49 }
  0x37   :  { %349 = vmatpush1.bf16.msra.mxu1 %v690_v23  ;;  %643 = vmatprep.subr.bf16.mxu0 %v724_v3 }
  0x38   :  { %350 = vmatprep.subr.bf16.mxu1 %v691_v24 }
  0x3a   :  { %644 = vmatpush3.bf16.msra.mxu0 %v725_v4 }
  0x3b   :  { %351 = vmatpush1.bf16.msra.mxu1 %v693_v25  ;;  %645 = vmatprep.subr.bf16.mxu0 %v726_v5 }
  0x3c   :  { %352 = vmatprep.subr.bf16.mxu1 %v694_v26 }
  0x3e   :  { %646 = vmatpush3.bf16.msra.mxu0 %v727_v6 }
  0x3f   :  { %353 = vmatpush1.bf16.msra.mxu1 %v696_v27 }
  0x40   :  { %354 = vmatprep.subr.bf16.mxu1 %v697_v28  ;;  %v554_v28 = vand.u32 127, %v49_v50 }
  0x42   :  { %vm558_vm1 = vcmp.lt.s32.totalorder %v554_v28, 4 }
  0x43   :  { %355 = vmatpush1.bf16.msra.mxu1 %v699_v29 }
  0x44   :  { %356 = vmatprep.subr.bf16.mxu1 %v700_v30 }
  0x47   :  { %357 = vmatpush1.bf16.msra.mxu1 %v702_v31 }
  0x48   :  { %358 = vmatprep.subr.bf16.mxu1 %v703_v32 }
  0x4b   :  { %359 = vmatpush1.bf16.msra.mxu1 %v705_v33 }
  0x4c   :  { %360 = vmatprep.subr.bf16.mxu1 %v706_v34 }
  0x4f   :  { %361 = vmatpush1.bf16.msra.mxu1 %v708_v35 }
  0x50   :  { %362 = vmatprep.subr.bf16.mxu1 %v709_v36 }
  0x53   :  { %363 = vmatpush1.bf16.msra.mxu1 %v711_v37 }
  0xef   :  { %v117_v57 = vpop.f32.mrb[0].mxu0 }
  0xf0   :  { %v118_v58 = vadd.f32 %v117_v57, %v52_v55  ;;  %v119_v59 = vpop.f32.mrb[1].mxu0 }
  0xf1   :  { %v120_v60 = vadd.f32 %v119_v59, %v56_v56  ;;  %v121_v61 = vpop.f32.mrb[2].mxu0 }
  0xf2   :  { %v124_v62 = vmax.f32 %v118_v58, 0.0  ;;  %v122_v63 = vpop.f32.mrb[3].mxu0 }
  0xf3   :  { %v125_v0 = vmax.f32 %v120_v60, 0.0 }
  0xf4   :  { %v126_v2 = vpack.c.bf16 %v124_v62, %v124_v62 }
  0xf5   :  { %v127_v1 = vpack.c.bf16 %v125_v0, %v125_v0 }
  0xf7   :  { %364 = vmatprep.mubr.bf16.mxu1 %v127_v1 }
  0xf8   :  { %365 = vmatmul.mubr.bf16.vlgmr.msra.gmra.mrb[0].mxu1 %v126_v2 }
 0x1cb   :  { %v366_v10 = vpop.f32.mrb[0].mxu1 }
 0x1cc   :  { %v367_v11 = vadd.f32 %v366_v10, %v165_v8  ;;  %v368_v12 = vpop.f32.mrb[1].mxu1 }
 0x1cd   :  { %v369_v13 = vadd.f32 %v368_v12, %v169_v9  ;;  %v370_v14 = vpop.f32.mrb[2].mxu1 }
 0x1ce   :  { %v373_v15 = vmax.f32 %v367_v11, 0.0  ;;  %v371_v16 = vpop.f32.mrb[3].mxu1 }
 0x1cf   :  { %v374_v17 = vmax.f32 %v369_v13, 0.0 }
 0x1d0   :  { %v375_v19 = vpack.c.bf16 %v373_v15, %v373_v15 }
 0x1d1   :  { %v376_v18 = vpack.c.bf16 %v374_v17, %v374_v17 }
 0x1d3   :  { %544 = vmatprep.mubr.bf16.mxu0 %v376_v18 }
 0x1d4   :  { %545 = vmatmul.mubr.bf16.vlgmr.msra.gmra.mrb[4].mxu0 %v375_v19 }
 0x2a7   :  { %v647_v20 = vpop.f32.mrb[4].mxu0 }
 0x2a8   :  { %v648_v22 = vpop.f32.mrb[5].mxu0 }
 0x2a9   :  { %v649_v23 = vadd.f32 %v648_v22, %v647_v20  ;;  %v650_v24 = vpop.f32.mrb[6].mxu0 }
 0x2aa   :  { %v651_v25 = vpop.f32.mrb[7].mxu0 }
 0x2ab   :  { %v547_v26 = vadd.f32 %v649_v23, %v614_v21 }
 0x2ad   :  { %728 = vtanh.f32 %v547_v26 }
 0x2b7   :  { %v729_v27 = vpop.eup %728 }
 0x2b8   :  { %v555_v29 = vadd.f32 1.0, %v729_v27 }
 0x2ba   :  { %v556_v30 = vmul.f32 3.5, %v555_v29 }
 0x2bc   :  { %v557_v31 = vadd.f32 -5.0, %v556_v30 }
 0x2be   :  { %v559_v32 = vsel %vm558_vm1, %v729_v27, %v557_v31 }
 0x2bf   :  { %561 = vst.msk [vmem:[#allocation5] sm:$0xff] %vm560_vm2, %v559_v32 }
 0x2c0   :  { %763 = shalt.err (!%p760_p12)
}
 0x2c1   :  { %s764_s12 = scalar_lea.hbm %s926_s7, 128 }
 0x2c2   :  { %p765_p13 = scmp.ne.s32.totalorder %s926_s7, %s764_s12  ;;  %p768_p0 = scmp.lt.u32.totalorder %s764_s12, %s926_s7 }
 0x2c4   :  { %p770_p1 = pnand %p768_p0, %p765_p13 }
 0x2c6   :  { %773 = shalt.err (!%p770_p1)
}
 0x2c7   :  { %571 = dma.vmem_to_hbm [thread:$0]  %s569_s9, 128, %s926_s7, [#allocation4]  }
 0x2c8   :  { %776 = dma.done.wait [#allocation4], 128  }
 0x2c9   :  { %777 = vsyncadd [#allocation4], 4294967168 }
 0x2ca   :  { %575 = vsyncpa [#allocation3], 1 }
 0x2cb   :  { %576 = vsyncpa [#allocation4], 1 }

</bundles_post_ra>
